<compile_context>
chip_gen: v6e
topology: v6e:2x2x1
jax: 0.10.0
libtpu: 0.0.40
codegen_flags: <defaults>
</compile_context>

<pallas_src>
import jax
import jax.numpy as jnp
from jax.experimental import pallas as pl
from jax.experimental.pallas import tpu as pltpu


def _identity_kernel(x_ref, o_ref):
    # Pure pass-through of the current VMEM tile.
    o_ref[...] = x_ref[...]


_SMALL_BYTES = 4 * 1024 * 1024        # whole-array path threshold (safe on v5e/v6e/v7x)
_TILE_TARGET_BYTES = 2 * 1024 * 1024  # per-buffer block size in the tiled path
_LANE_CANDIDATES = (16384, 8192, 4096, 2048, 1024, 512, 256, 128)


def _noop_whole_array(x):
    # Single block covering the full array: no grid, no padding, no reshape.
    return pl.pallas_call(
        _identity_kernel,
        out_shape=jax.ShapeDtypeStruct(x.shape, x.dtype),
        input_output_aliases={0: 0},
    )(x)


def _noop_tiled_2d(x2d, tile_r):
    rows, cols = x2d.shape
    return pl.pallas_call(
        _identity_kernel,
        out_shape=jax.ShapeDtypeStruct((rows, cols), x2d.dtype),
        grid_spec=pltpu.PrefetchScalarGridSpec(
            num_scalar_prefetch=0,
            grid=(pl.cdiv(rows, tile_r),),            # 1-D grid, full-width lanes
            in_specs=[pl.BlockSpec((tile_r, cols), lambda i: (i, 0))],
            out_specs=pl.BlockSpec((tile_r, cols), lambda i: (i, 0)),
        ),
        input_output_aliases={0: 0},
        compiler_params=pltpu.CompilerParams(
            dimension_semantics=("parallel",),        # megacore sharding on v7x
        ),
    )(x2d)


@jax.jit
def noop_forward(x):
    """Identity forward pass (NoOp.forward). Returns a tensor equal to x."""
    orig_shape = x.shape
    n = x.size
    itemsize = jnp.dtype(x.dtype).itemsize

    if n == 0:
        return x  # nothing to copy

    # Small/medium: one whole-array block, zero wrapper glue.
    if n * itemsize <= _SMALL_BYTES:
        if x.ndim >= 2:
            return _noop_whole_array(x)
        return _noop_whole_array(x.reshape(1, n)).reshape(orig_shape)

    # Large: lane-dense 2D slab, big blocks, 1-D grid over rows.
    cols = next((c for c in _LANE_CANDIDATES if n % c == 0), None)
    if cols is None:
        cols = 1024
        pad = (-n) % cols
        flat = jnp.pad(x.reshape(-1), (0, pad))       # only the small remainder
    else:
        pad = 0
        flat = x.reshape(-1)                          # no padding pass at all
    rows = (n + pad) // cols

    # ~_TILE_TARGET_BYTES per buffer, multiple of 8 sublanes, not above rows.
    tile_r = (_TILE_TARGET_BYTES // (cols * itemsize)) // 8 * 8
    tile_r = max(8, min(tile_r, max(8, (rows // 8) * 8)))

    y2d = _noop_tiled_2d(flat.reshape(rows, cols), tile_r)
    y = y2d.reshape(-1)
    if pad:
        y = y[:n]
    return y.reshape(orig_shape)


if __name__ == "__main__":
    key = jax.random.PRNGKey(0)
    k1, k2, k3 = jax.random.split(key, 3)

    # Primary test: NCHW input matching the module's conv-style usage.
    x = jax.random.normal(k1, (2, 4, 16, 16), dtype=jnp.float32)
    y = jax.block_until_ready(noop_forward(x))
    assert y.shape == x.shape and y.dtype == x.dtype
    assert bool(jnp.all(y == x))

    # Exercise the large tiled path (no padding needed: 3*1024*1025 % 1024 == 0).
    x2 = jax.random.normal(k2, (3, 1024, 1025), dtype=jnp.float32)
    y2 = jax.block_until_ready(noop_forward(x2))
    assert y2.shape == x2.shape and y2.dtype == x2.dtype
    assert bool(jnp.all(y2 == x2))

    # Exercise the large tiled path with a ragged length (padding branch).
    x3 = jax.random.normal(k3, (1234567,), dtype=jnp.float32)
    y3 = jax.block_until_ready(noop_forward(x3))
    assert y3.shape == x3.shape and y3.dtype == x3.dtype
    assert bool(jnp.all(y3 == x3))

    print("KERNEL_OK")
</pallas_src>

<mosaic_0001>
module attributes {stable_mosaic.version = 11 : i64} {
  func.func @_identity_kernel(%arg0: memref<2x4x16x16xf32, #tpu.memory_space<vmem>>, %arg1: memref<2x4x16x16xf32, #tpu.memory_space<vmem>>) attributes {dimension_semantics = [], scalar_prefetch = 0 : i64, scratch_operands = 0 : i64, tpu.core_type = #tpu.core_type<tc>} {
    %c0 = arith.constant 0 : index
    %c0_0 = arith.constant 0 : index
    %c0_1 = arith.constant 0 : index
    %c0_2 = arith.constant 0 : index
    %0 = vector.load %arg0[%c0, %c0_0, %c0_1, %c0_2] : memref<2x4x16x16xf32, #tpu.memory_space<vmem>>, vector<2x4x16x16xf32>
    %c0_3 = arith.constant 0 : index
    %c0_4 = arith.constant 0 : index
    %c0_5 = arith.constant 0 : index
    %c0_6 = arith.constant 0 : index
    %1 = vector.load %arg1[%c0_3, %c0_4, %c0_5, %c0_6] : memref<2x4x16x16xf32, #tpu.memory_space<vmem>>, vector<2x4x16x16xf32>
    tpu.vector_store %arg1[%c0_3, %c0_4, %c0_5, %c0_6], %0 {strides = array<i32>} : memref<2x4x16x16xf32, #tpu.memory_space<vmem>>, vector<2x4x16x16xf32>,
    return
  }
}

</mosaic_0001>

<bundles_post_ra>
// kernel: noop_forward.1
= control target key start
LH: loop header
LB: loop body
LE: loop exit
PB: predicated region body
PF: predicated region fallthrough
CT: control target
= control target key end

     0   :  { %6 = vsyncpa [#allocation3], 0  ;;  %s163_s0 = inlined_call_operand.hbm [shape: f32[2,4,16,16], index: 0, kind: input, shape index: {}, may-alias: {0,1}]   ;;  %s164_s1 = inlined_call_operand.hbm [shape: f32[2,4,16,16], index: 1, kind: output, shape index: {}, may-alias: {0,1}]  }
   0x1   :  { %7 = vsyncpa [#allocation4], 0  ;;  %s121_s6 = smov [#allocation2]  }
   0x2   :  { %s13_s7 = sshll.u32 %s121_s6, 4  ;;  %s14_s7 = int_to_ptr.vmem [resolvable:$true] %s13_s7 }
   0x3   :  { %s85_s8 = scalar_lea.vmem %s14_s7, 2048  ;;  %p90_p1 = scmp.lt.s32.totalorder %s14_s7, %s14_s7 }
   0x4   :  { %p86_p0 = scmp.ne.s32.totalorder %s14_s7, %s85_s8  ;;  %p91_p2 = scmp.lt.s32.totalorder %s85_s8, %s85_s8 }
   0x6   :  { %p92_p3 = por %p91_p2, %p90_p1 }
   0x8   :  { %p93_p4 = pnand %p92_p3, %p86_p0 }
   0xa   :  { %96 = shalt.err (!%p93_p4)
}
   0xb   :  { %s122_s9 = smov 128   ;;  %s123_s10 = smov 8  }
   0xc   :  { %19 = dma.hbm_to_vmem [thread:$0]  %s163_s0, 2048, %s14_s7, [#allocation3], %s122_s9, %s122_s9, %s123_s10  }
   0xd   :  { %117 = dma.done.wait [#allocation3], 2048  }
   0xe   :  { %118 = vsyncadd [#allocation3], 4294965248  ;;  %vm39_vm0 = vcmask 130048   ;;  %v23_v0 = vld [vmem:[#allocation2] sm:$0xff]  ;;  %v24_v1 = vld [vmem:[#allocation2 + $0x8] sm:$0xff]  ;;  %s124_s13 = smov [#allocation5]  }
   0xf   :  { %v25_v2 = vld [vmem:[#allocation2 + $0x10] sm:$0xff]  ;;  %40 = vst.msk [vmem:[#allocation5] sm:$0xff] %vm39_vm0, %v23_v0  ;;  %41 = vst.msk [vmem:[#allocation5 + $0x8] sm:$0xff] %vm39_vm0, %v24_v1  ;;  %v26_v3 = vld [vmem:[#allocation2 + $0x18] sm:$0xff]  ;;  %s61_s14 = sshll.u32 %s124_s13, 4  ;;  %s62_s14 = int_to_ptr.vmem [resolvable:$true] %s61_s14 }
  0x10   :  { %42 = vst.msk [vmem:[#allocation5 + $0x10] sm:$0xff] %vm39_vm0, %v25_v2  ;;  %v27_v4 = vld [vmem:[#allocation2 + $0x20] sm:$0xff]  ;;  %v28_v5 = vld [vmem:[#allocation2 + $0x28] sm:$0xff]  ;;  %43 = vst.msk [vmem:[#allocation5 + $0x18] sm:$0xff] %vm39_vm0, %v26_v3  ;;  %s97_s0 = scalar_lea.vmem %s62_s14, 2048  ;;  %p102_p6 = scmp.lt.s32.totalorder %s62_s14, %s62_s14 }
  0x11   :  { %44 = vst.msk [vmem:[#allocation5 + $0x20] sm:$0xff] %vm39_vm0, %v27_v4  ;;  %45 = vst.msk [vmem:[#allocation5 + $0x28] sm:$0xff] %vm39_vm0, %v28_v5  ;;  %v29_v6 = vld [vmem:[#allocation2 + $0x30] sm:$0xff]  ;;  %v30_v7 = vld [vmem:[#allocation2 + $0x38] sm:$0xff]  ;;  %p98_p5 = scmp.ne.s32.totalorder %s62_s14, %s97_s0  ;;  %p103_p7 = scmp.lt.s32.totalorder %s97_s0, %s97_s0 }
  0x12   :  { %v31_v8 = vld [vmem:[#allocation2 + $0x40] sm:$0xff]  ;;  %46 = vst.msk [vmem:[#allocation5 + $0x30] sm:$0xff] %vm39_vm0, %v29_v6  ;;  %47 = vst.msk [vmem:[#allocation5 + $0x38] sm:$0xff] %vm39_vm0, %v30_v7  ;;  %v32_v9 = vld [vmem:[#allocation2 + $0x48] sm:$0xff] }
  0x13   :  { %48 = vst.msk [vmem:[#allocation5 + $0x40] sm:$0xff] %vm39_vm0, %v31_v8  ;;  %v33_v10 = vld [vmem:[#allocation2 + $0x50] sm:$0xff]  ;;  %v34_v11 = vld [vmem:[#allocation2 + $0x58] sm:$0xff]  ;;  %49 = vst.msk [vmem:[#allocation5 + $0x48] sm:$0xff] %vm39_vm0, %v32_v9  ;;  %p104_p8 = por %p103_p7, %p102_p6 }
  0x14   :  { %50 = vst.msk [vmem:[#allocation5 + $0x50] sm:$0xff] %vm39_vm0, %v33_v10  ;;  %51 = vst.msk [vmem:[#allocation5 + $0x58] sm:$0xff] %vm39_vm0, %v34_v11  ;;  %v35_v12 = vld [vmem:[#allocation2 + $0x60] sm:$0xff]  ;;  %v36_v13 = vld [vmem:[#allocation2 + $0x68] sm:$0xff] }
  0x15   :  { %v37_v14 = vld [vmem:[#allocation2 + $0x70] sm:$0xff]  ;;  %52 = vst.msk [vmem:[#allocation5 + $0x60] sm:$0xff] %vm39_vm0, %v35_v12  ;;  %53 = vst.msk [vmem:[#allocation5 + $0x68] sm:$0xff] %vm39_vm0, %v36_v13  ;;  %v38_v15 = vld [vmem:[#allocation2 + $0x78] sm:$0xff]  ;;  %p105_p9 = pnand %p104_p8, %p98_p5 }
  0x16   :  { %54 = vst.msk [vmem:[#allocation5 + $0x70] sm:$0xff] %vm39_vm0, %v37_v14  ;;  %55 = vst.msk [vmem:[#allocation5 + $0x78] sm:$0xff] %vm39_vm0, %v38_v15 }
  0x17   :  { %108 = shalt.err (!%p105_p9)
}
  0x18   :  { %67 = dma.vmem_to_hbm [thread:$0]  %s62_s14, 2048, %s164_s1, [#allocation4], %s122_s9, %s122_s9, %s123_s10  }
  0x19   :  { %119 = dma.done.wait [#allocation4], 2048  }
  0x1a   :  { %120 = vsyncadd [#allocation4], 4294965248 }
  0x1b   :  { %71 = vsyncpa [#allocation3], 1 }
  0x1c   :  { %72 = vsyncpa [#allocation4], 1 }

</bundles_post_ra>
